<compile_context>
chip_gen: v5e
topology: v5e:2x2
jax: 0.10.0
libtpu: 0.0.40
codegen_flags: <defaults>
</compile_context>

<pallas_src>
import jax
import jax.numpy as jnp
from jax.experimental import pallas as pl
from jax.experimental.pallas import tpu as pltpu

_LN_EPS = 1e-5  # torch.nn.LayerNorm default


def _layernorm(h, gamma, beta):
    # torch LayerNorm: biased variance over the last (feature) dim.
    m = jnp.mean(h, axis=-1, keepdims=True)
    v = jnp.mean(jnp.square(h - m), axis=-1, keepdims=True)
    return (h - m) * jax.lax.rsqrt(v + _LN_EPS) * gamma + beta


def ddpg_actor_kernel(x_ref,
                      w1_ref, b1_ref, g1_ref, be1_ref,
                      w2_ref, b2_ref, g2_ref, be2_ref,
                      wmu_ref, bmu_ref,
                      out_ref):
    # x_ref  : [TB, IN]  bf16
    # w1_ref : [IN, H1]  bf16   b1/g1/be1 : [1, H1] f32
    # w2_ref : [H1, H2]  bf16   b2/g2/be2 : [1, H2] f32
    # wmu_ref: [H2, A]   bf16   bmu       : [1, A]  f32
    # out_ref: [TB, A]   f32
    x = x_ref[...]

    # fc1 (bf16 MXU operands, f32 accumulate) + LayerNorm + ReLU
    h = jnp.dot(x, w1_ref[...], preferred_element_type=jnp.float32) + b1_ref[...]
    h = jnp.maximum(_layernorm(h, g1_ref[...], be1_ref[...]), 0.0)

    # fc2 + LayerNorm (reference module has NO ReLU after bn2)
    h = jnp.dot(h.astype(w2_ref.dtype), w2_ref[...],
                preferred_element_type=jnp.float32) + b2_ref[...]
    h = _layernorm(h, g2_ref[...], be2_ref[...])

    # mu head + tanh
    a = jnp.dot(h.astype(wmu_ref.dtype), wmu_ref[...],
                preferred_element_type=jnp.float32) + bmu_ref[...]
    out_ref[...] = jnp.tanh(a).astype(out_ref.dtype)


def _auto_block_b(batch):
    """Pick a batch tile: big tiles for big batches, 2-step grid otherwise."""
    if batch > 1024:
        return 512                      # 256-512 rows amortize step overhead
    if batch <= 16:
        return batch                    # single resident tile
    # 2-step grid (keeps both v7x TensorCores busy); multiple of 16 so the
    # bf16 input tile satisfies sublane packing even on the ragged last block.
    return min(512, 16 * pl.cdiv(batch, 32))


def ddpg_actor_forward(state, params, *, block_b=None):
    """state: [B, in_dim] f32 -> actions [B, n_actions] f32."""
    (w1, b1, g1, be1, w2, b2, g2, be2, wmu, bmu) = params
    B, in_dim = state.shape
    h1 = w1.shape[1]
    h2 = w2.shape[1]
    n_act = wmu.shape[1]

    if block_b is None:
        block_b = _auto_block_b(B)
    if block_b != B:
        assert block_b % 16 == 0, "block_b must be a multiple of 16 (bf16 sublanes)"
    nb = pl.cdiv(B, block_b)   # ragged last block is masked by Pallas; no host pad

    # Ship activations as bf16: the kernel feeds bf16 to the MXU anyway, and
    # this halves the per-step input DMA bytes.
    x = state.astype(jnp.bfloat16)

    def resident(arr):
        # Full-array block, constant index_map -> stays in VMEM across the grid.
        return pl.BlockSpec(arr.shape, lambda i: (0, 0))

    param_bytes = sum(int(p.size) * p.dtype.itemsize for p in params)
    cost = pl.CostEstimate(
        flops=2 * B * (in_dim * h1 + h1 * h2 + h2 * n_act),
        transcendentals=B * (2 + n_act),                    # rsqrt x2 + tanh per row
        bytes_accessed=int(x.size) * 2 + B * n_act * 4 + param_bytes,
    )

    return pl.pallas_call(
        ddpg_actor_kernel,
        out_shape=jax.ShapeDtypeStruct((B, n_act), jnp.float32),
        grid_spec=pltpu.PrefetchScalarGridSpec(
            num_scalar_prefetch=0,
            grid=(nb,),
            in_specs=[
                pl.BlockSpec((block_b, in_dim), lambda i: (i, 0)),   # x tile
                resident(w1), resident(b1), resident(g1), resident(be1),
                resident(w2), resident(b2), resident(g2), resident(be2),
                resident(wmu), resident(bmu),
            ],
            out_specs=pl.BlockSpec((block_b, n_act), lambda i: (i, 0)),
        ),
        compiler_params=pltpu.CompilerParams(
            dimension_semantics=("parallel",)),   # v7x: shard batch across TCs
        cost_estimate=cost,
    )(x, w1, b1, g1, be1, w2, b2, g2, be2, wmu, bmu)


def init_params(key, in_dim, fc1_dims, fc2_dims, n_actions):
    """Mimic the module's init: U(-1/sqrt(out), +) for fc1/fc2 (it uses
    weight.size()[0] == out_features), U(-0.003, 0.003) for mu, LayerNorm
    gamma=1 / beta=0.  Weights stored [in, out] and cast to bf16 (MXU)."""
    ks = jax.random.split(key, 6)

    def lin(kw, kb, fan_in, fan_out, bound):
        w = jax.random.uniform(kw, (fan_in, fan_out), jnp.float32, -bound, bound)
        b = jax.random.uniform(kb, (1, fan_out), jnp.float32, -bound, bound)
        return w.astype(jnp.bfloat16), b

    f1 = 1.0 / float(jnp.sqrt(jnp.float32(fc1_dims)))
    f2 = 1.0 / float(jnp.sqrt(jnp.float32(fc2_dims)))
    f3 = 0.003

    w1, b1 = lin(ks[0], ks[1], in_dim, fc1_dims, f1)
    g1 = jnp.ones((1, fc1_dims), jnp.float32)
    be1 = jnp.zeros((1, fc1_dims), jnp.float32)

    w2, b2 = lin(ks[2], ks[3], fc1_dims, fc2_dims, f2)
    g2 = jnp.ones((1, fc2_dims), jnp.float32)
    be2 = jnp.zeros((1, fc2_dims), jnp.float32)

    wmu, bmu = lin(ks[4], ks[5], fc2_dims, n_actions, f3)
    return (w1, b1, g1, be1, w2, b2, g2, be2, wmu, bmu)


def reference_forward(state, params):
    """Pure-JAX reference with the same dtype policy as the kernel."""
    w1, b1, g1, be1, w2, b2, g2, be2, wmu, bmu = params
    h = jnp.dot(state.astype(w1.dtype), w1,
                preferred_element_type=jnp.float32) + b1
    h = jnp.maximum(_layernorm(h, g1, be1), 0.0)
    h = jnp.dot(h.astype(w2.dtype), w2,
                preferred_element_type=jnp.float32) + b2
    h = _layernorm(h, g2, be2)
    a = jnp.dot(h.astype(wmu.dtype), wmu,
                preferred_element_type=jnp.float32) + bmu
    return jnp.tanh(a)


if __name__ == "__main__":
    # Small shapes consistent with DDPGActor.forward:
    #   state: [B, input_dims[0]], hidden = (fc1_dims, fc2_dims), out = n_actions
    # B=32 -> auto block_b=16 -> 2-step parallel grid (exercises the pipeline
    # and megacore sharding).  Hidden dims kept at 128 multiples for full
    # MXU tiles; the real 400/300 sizes also work (masked lanes, see header).
    B, IN_DIM, FC1, FC2, N_ACTIONS = 32, 8, 128, 128, 2

    key = jax.random.PRNGKey(0)
    k_s, k_p = jax.random.split(key)
    state = jax.random.normal(k_s, (B, IN_DIM), jnp.float32)
    params = init_params(k_p, IN_DIM, FC1, FC2, N_ACTIONS)

    act = jax.block_until_ready(ddpg_actor_forward(state, params))

    act_ref = reference_forward(state, params)
    assert act.shape == (B, N_ACTIONS)
    assert bool(jnp.all(jnp.abs(act) <= 1.0 + 1e-6))          # tanh range
    assert jnp.allclose(act, act_ref, atol=2e-3, rtol=2e-3)

    # TODO(synk): optimizer (Adam) / device placement from the module are
    # training plumbing, not part of the forward pass, and are not translated.
    print("KERNEL_OK")
</pallas_src>

<mosaic_0001>
module attributes {stable_mosaic.version = 11 : i64} {
  func.func @ddpg_actor_kernel(%arg0: i32, %arg1: memref<16x8xbf16, #tpu.memory_space<vmem>>, %arg2: memref<8x128xbf16, #tpu.memory_space<vmem>>, %arg3: memref<1x128xf32, #tpu.memory_space<vmem>>, %arg4: memref<1x128xf32, #tpu.memory_space<vmem>>, %arg5: memref<1x128xf32, #tpu.memory_space<vmem>>, %arg6: memref<128x128xbf16, #tpu.memory_space<vmem>>, %arg7: memref<1x128xf32, #tpu.memory_space<vmem>>, %arg8: memref<1x128xf32, #tpu.memory_space<vmem>>, %arg9: memref<1x128xf32, #tpu.memory_space<vmem>>, %arg10: memref<128x2xbf16, #tpu.memory_space<vmem>>, %arg11: memref<1x2xf32, #tpu.memory_space<vmem>>, %arg12: memref<16x2xf32, #tpu.memory_space<vmem>>) attributes {dimension_semantics = [#tpu.dimension_semantics<parallel>], iteration_bounds = array<i64: 2>, scalar_prefetch = 0 : i64, scratch_operands = 0 : i64, tpu.core_type = #tpu.core_type<tc>, window_params = [{transform_indices = @transform_0, window_bounds = array<i64: 16, 8>}, {pipeline_mode = #tpu.pipeline_mode<synchronous>, transform_indices = @transform_1, window_bounds = array<i64: 8, 128>}, {pipeline_mode = #tpu.pipeline_mode<synchronous>, transform_indices = @transform_2, window_bounds = array<i64: 1, 128>}, {pipeline_mode = #tpu.pipeline_mode<synchronous>, transform_indices = @transform_3, window_bounds = array<i64: 1, 128>}, {pipeline_mode = #tpu.pipeline_mode<synchronous>, transform_indices = @transform_4, window_bounds = array<i64: 1, 128>}, {pipeline_mode = #tpu.pipeline_mode<synchronous>, transform_indices = @transform_5, window_bounds = array<i64: 128, 128>}, {pipeline_mode = #tpu.pipeline_mode<synchronous>, transform_indices = @transform_6, window_bounds = array<i64: 1, 128>}, {pipeline_mode = #tpu.pipeline_mode<synchronous>, transform_indices = @transform_7, window_bounds = array<i64: 1, 128>}, {pipeline_mode = #tpu.pipeline_mode<synchronous>, transform_indices = @transform_8, window_bounds = array<i64: 1, 128>}, {pipeline_mode = #tpu.pipeline_mode<synchronous>, transform_indices = @transform_9, window_bounds = array<i64: 128, 2>}, {pipeline_mode = #tpu.pipeline_mode<synchronous>, transform_indices = @transform_10, window_bounds = array<i64: 1, 2>}, {transform_indices = @transform_11, window_bounds = array<i64: 16, 2>}]} {
    %c0 = arith.constant 0 : index
    %c0_0 = arith.constant 0 : index
    %0 = vector.load %arg1[%c0, %c0_0] : memref<16x8xbf16, #tpu.memory_space<vmem>>, vector<16x8xbf16>
    %c0_1 = arith.constant 0 : index
    %c0_2 = arith.constant 0 : index
    %1 = vector.load %arg2[%c0_1, %c0_2] : memref<8x128xbf16, #tpu.memory_space<vmem>>, vector<8x128xbf16>
    %cst = arith.constant dense<0.000000e+00> : vector<16x128xf32>
    %2 = tpu.matmul %0, %1, %cst {dimension_numbers = #tpu.dot_dimension_numbers<[1], [0], [0], [1], [0, 0, 1, 1], [], []>} : vector<16x8xbf16>, vector<8x128xbf16>, vector<16x128xf32> -> vector<16x128xf32>
    %c0_3 = arith.constant 0 : index
    %c0_4 = arith.constant 0 : index
    %3 = vector.load %arg3[%c0_3, %c0_4] : memref<1x128xf32, #tpu.memory_space<vmem>>, vector<1x128xf32>
    %4 = vector.broadcast %3 : vector<1x128xf32> to vector<16x128xf32>
    %5 = arith.addf %2, %4 : vector<16x128xf32>
    %c0_5 = arith.constant 0 : index
    %c0_6 = arith.constant 0 : index
    %6 = vector.load %arg4[%c0_5, %c0_6] : memref<1x128xf32, #tpu.memory_space<vmem>>, vector<1x128xf32>
    %c0_7 = arith.constant 0 : index
    %c0_8 = arith.constant 0 : index
    %7 = vector.load %arg5[%c0_7, %c0_8] : memref<1x128xf32, #tpu.memory_space<vmem>>, vector<1x128xf32>
    %cst_9 = arith.constant dense<0.000000e+00> : vector<16xf32>
    %8 = vector.multi_reduction <add>, %5, %cst_9 [1] : vector<16x128xf32> to vector<16xf32>
    %9 = vector.shape_cast %8 : vector<16xf32> to vector<16x1xf32>
    %cst_10 = arith.constant 1.280000e+02 : f32
    %10 = vector.broadcast %cst_10 : f32 to vector<16x1xf32>
    %11 = arith.divf %9, %10 : vector<16x1xf32>
    %12 = vector.broadcast %11 : vector<16x1xf32> to vector<16x128xf32>
    %13 = arith.subf %5, %12 : vector<16x128xf32>
    %14 = arith.mulf %13, %13 : vector<16x128xf32>
    %cst_11 = arith.constant dense<0.000000e+00> : vector<16xf32>
    %15 = vector.multi_reduction <add>, %14, %cst_11 [1] : vector<16x128xf32> to vector<16xf32>
    %16 = vector.shape_cast %15 : vector<16xf32> to vector<16x1xf32>
    %cst_12 = arith.constant 1.280000e+02 : f32
    %17 = vector.broadcast %cst_12 : f32 to vector<16x1xf32>
    %18 = arith.divf %16, %17 : vector<16x1xf32>
    %19 = vector.broadcast %11 : vector<16x1xf32> to vector<16x128xf32>
    %20 = arith.subf %5, %19 : vector<16x128xf32>
    %cst_13 = arith.constant 9.99999974E-6 : f32
    %21 = vector.broadcast %cst_13 : f32 to vector<16x1xf32>
    %22 = arith.addf %18, %21 : vector<16x1xf32>
    %23 = math.rsqrt %22 : vector<16x1xf32>
    %24 = vector.broadcast %23 : vector<16x1xf32> to vector<16x128xf32>
    %25 = arith.mulf %20, %24 : vector<16x128xf32>
    %26 = vector.broadcast %6 : vector<1x128xf32> to vector<16x128xf32>
    %27 = arith.mulf %25, %26 : vector<16x128xf32>
    %28 = vector.broadcast %7 : vector<1x128xf32> to vector<16x128xf32>
    %29 = arith.addf %27, %28 : vector<16x128xf32>
    %cst_14 = arith.constant 0.000000e+00 : f32
    %30 = vector.broadcast %cst_14 : f32 to vector<16x128xf32>
    %31 = arith.maximumf %29, %30 : vector<16x128xf32>
    %32 = arith.truncf %31 : vector<16x128xf32> to vector<16x128xbf16>
    %c0_15 = arith.constant 0 : index
    %c0_16 = arith.constant 0 : index
    %33 = vector.load %arg6[%c0_15, %c0_16] : memref<128x128xbf16, #tpu.memory_space<vmem>>, vector<128x128xbf16>
    %cst_17 = arith.constant dense<0.000000e+00> : vector<16x128xf32>
    %34 = tpu.matmul %32, %33, %cst_17 {dimension_numbers = #tpu.dot_dimension_numbers<[1], [0], [0], [1], [0, 0, 1, 1], [], []>} : vector<16x128xbf16>, vector<128x128xbf16>, vector<16x128xf32> -> vector<16x128xf32>
    %c0_18 = arith.constant 0 : index
    %c0_19 = arith.constant 0 : index
    %35 = vector.load %arg7[%c0_18, %c0_19] : memref<1x128xf32, #tpu.memory_space<vmem>>, vector<1x128xf32>
    %36 = vector.broadcast %35 : vector<1x128xf32> to vector<16x128xf32>
    %37 = arith.addf %34, %36 : vector<16x128xf32>
    %c0_20 = arith.constant 0 : index
    %c0_21 = arith.constant 0 : index
    %38 = vector.load %arg8[%c0_20, %c0_21] : memref<1x128xf32, #tpu.memory_space<vmem>>, vector<1x128xf32>
    %c0_22 = arith.constant 0 : index
    %c0_23 = arith.constant 0 : index
    %39 = vector.load %arg9[%c0_22, %c0_23] : memref<1x128xf32, #tpu.memory_space<vmem>>, vector<1x128xf32>
    %cst_24 = arith.constant dense<0.000000e+00> : vector<16xf32>
    %40 = vector.multi_reduction <add>, %37, %cst_24 [1] : vector<16x128xf32> to vector<16xf32>
    %41 = vector.shape_cast %40 : vector<16xf32> to vector<16x1xf32>
    %cst_25 = arith.constant 1.280000e+02 : f32
    %42 = vector.broadcast %cst_25 : f32 to vector<16x1xf32>
    %43 = arith.divf %41, %42 : vector<16x1xf32>
    %44 = vector.broadcast %43 : vector<16x1xf32> to vector<16x128xf32>
    %45 = arith.subf %37, %44 : vector<16x128xf32>
    %46 = arith.mulf %45, %45 : vector<16x128xf32>
    %cst_26 = arith.constant dense<0.000000e+00> : vector<16xf32>
    %47 = vector.multi_reduction <add>, %46, %cst_26 [1] : vector<16x128xf32> to vector<16xf32>
    %48 = vector.shape_cast %47 : vector<16xf32> to vector<16x1xf32>
    %cst_27 = arith.constant 1.280000e+02 : f32
    %49 = vector.broadcast %cst_27 : f32 to vector<16x1xf32>
    %50 = arith.divf %48, %49 : vector<16x1xf32>
    %51 = vector.broadcast %43 : vector<16x1xf32> to vector<16x128xf32>
    %52 = arith.subf %37, %51 : vector<16x128xf32>
    %cst_28 = arith.constant 9.99999974E-6 : f32
    %53 = vector.broadcast %cst_28 : f32 to vector<16x1xf32>
    %54 = arith.addf %50, %53 : vector<16x1xf32>
    %55 = math.rsqrt %54 : vector<16x1xf32>
    %56 = vector.broadcast %55 : vector<16x1xf32> to vector<16x128xf32>
    %57 = arith.mulf %52, %56 : vector<16x128xf32>
    %58 = vector.broadcast %38 : vector<1x128xf32> to vector<16x128xf32>
    %59 = arith.mulf %57, %58 : vector<16x128xf32>
    %60 = vector.broadcast %39 : vector<1x128xf32> to vector<16x128xf32>
    %61 = arith.addf %59, %60 : vector<16x128xf32>
    %62 = arith.truncf %61 : vector<16x128xf32> to vector<16x128xbf16>
    %c0_29 = arith.constant 0 : index
    %c0_30 = arith.constant 0 : index
    %63 = vector.load %arg10[%c0_29, %c0_30] : memref<128x2xbf16, #tpu.memory_space<vmem>>, vector<128x2xbf16>
    %cst_31 = arith.constant dense<0.000000e+00> : vector<16x2xf32>
    %64 = tpu.matmul %62, %63, %cst_31 {dimension_numbers = #tpu.dot_dimension_numbers<[1], [0], [0], [1], [0, 0, 1, 1], [], []>} : vector<16x128xbf16>, vector<128x2xbf16>, vector<16x2xf32> -> vector<16x2xf32>
    %c0_32 = arith.constant 0 : index
    %c0_33 = arith.constant 0 : index
    %65 = vector.load %arg11[%c0_32, %c0_33] : memref<1x2xf32, #tpu.memory_space<vmem>>, vector<1x2xf32>
    %66 = vector.broadcast %65 : vector<1x2xf32> to vector<16x2xf32>
    %67 = arith.addf %64, %66 : vector<16x2xf32>
    %68 = math.tanh %67 : vector<16x2xf32>
    %c0_34 = arith.constant 0 : index
    %c0_35 = arith.constant 0 : index
    %69 = vector.load %arg12[%c0_34, %c0_35] : memref<16x2xf32, #tpu.memory_space<vmem>>, vector<16x2xf32>
    tpu.vector_store %arg12[%c0_34, %c0_35], %68 {strides = array<i32>} : memref<16x2xf32, #tpu.memory_space<vmem>>, vector<16x2xf32>,
    return
  }
  func.func @transform_0(%arg0: i32) -> (i32, i32) {
    %c0_i32 = arith.constant 0 : i32
    %c0_i32_0 = arith.constant 0 : i32
    return %arg0, %c0_i32 : i32, i32
  }
  func.func @transform_1(%arg0: i32) -> (i32, i32) {
    %c0_i32 = arith.constant 0 : i32
    %c0_i32_0 = arith.constant 0 : i32
    %c0_i32_1 = arith.constant 0 : i32
    return %c0_i32, %c0_i32_0 : i32, i32
  }
  func.func @transform_2(%arg0: i32) -> (i32, i32) {
    %c0_i32 = arith.constant 0 : i32
    %c0_i32_0 = arith.constant 0 : i32
    %c0_i32_1 = arith.constant 0 : i32
    return %c0_i32, %c0_i32_0 : i32, i32
  }
  func.func @transform_3(%arg0: i32) -> (i32, i32) {
    %c0_i32 = arith.constant 0 : i32
    %c0_i32_0 = arith.constant 0 : i32
    %c0_i32_1 = arith.constant 0 : i32
    return %c0_i32, %c0_i32_0 : i32, i32
  }
  func.func @transform_4(%arg0: i32) -> (i32, i32) {
    %c0_i32 = arith.constant 0 : i32
    %c0_i32_0 = arith.constant 0 : i32
    %c0_i32_1 = arith.constant 0 : i32
    return %c0_i32, %c0_i32_0 : i32, i32
  }
  func.func @transform_5(%arg0: i32) -> (i32, i32) {
    %c0_i32 = arith.constant 0 : i32
    %c0_i32_0 = arith.constant 0 : i32
    %c0_i32_1 = arith.constant 0 : i32
    return %c0_i32, %c0_i32_0 : i32, i32
  }
  func.func @transform_6(%arg0: i32) -> (i32, i32) {
    %c0_i32 = arith.constant 0 : i32
    %c0_i32_0 = arith.constant 0 : i32
    %c0_i32_1 = arith.constant 0 : i32
    return %c0_i32, %c0_i32_0 : i32, i32
  }
  func.func @transform_7(%arg0: i32) -> (i32, i32) {
    %c0_i32 = arith.constant 0 : i32
    %c0_i32_0 = arith.constant 0 : i32
    %c0_i32_1 = arith.constant 0 : i32
    return %c0_i32, %c0_i32_0 : i32, i32
  }
  func.func @transform_8(%arg0: i32) -> (i32, i32) {
    %c0_i32 = arith.constant 0 : i32
    %c0_i32_0 = arith.constant 0 : i32
    %c0_i32_1 = arith.constant 0 : i32
    return %c0_i32, %c0_i32_0 : i32, i32
  }
  func.func @transform_9(%arg0: i32) -> (i32, i32) {
    %c0_i32 = arith.constant 0 : i32
    %c0_i32_0 = arith.constant 0 : i32
    %c0_i32_1 = arith.constant 0 : i32
    return %c0_i32, %c0_i32_0 : i32, i32
  }
  func.func @transform_10(%arg0: i32) -> (i32, i32) {
    %c0_i32 = arith.constant 0 : i32
    %c0_i32_0 = arith.constant 0 : i32
    %c0_i32_1 = arith.constant 0 : i32
    return %c0_i32, %c0_i32_0 : i32, i32
  }
  func.func @transform_11(%arg0: i32) -> (i32, i32) {
    %c0_i32 = arith.constant 0 : i32
    %c0_i32_0 = arith.constant 0 : i32
    return %arg0, %c0_i32 : i32, i32
  }
}

</mosaic_0001>

<bundles_post_ra>
// kernel: tpu_custom_call.1
= control target key start
LH: loop header
LB: loop body
LE: loop exit
PB: predicated region body
PF: predicated region fallthrough
CT: control target
= control target key end

     0   :  { %s961_s17 = smov 0   ;;  %s1064_s0 = inlined_call_operand.vmem [shape: bf16[32,8], index: 0, kind: input, shape index: {}]   ;;  %s1065_s1 = inlined_call_operand.vmem [shape: bf16[8,128], index: 1, kind: input, shape index: {}]   ;;  %s1066_s2 = inlined_call_operand.vmem [shape: f32[1,128], index: 2, kind: input, shape index: {}]   ;;  %s1067_s3 = inlined_call_operand.vmem [shape: f32[1,128], index: 3, kind: input, shape index: {}]   ;;  %s1068_s4 = inlined_call_operand.vmem [shape: f32[1,128], index: 4, kind: input, shape index: {}]   ;;  %s1069_s5 = inlined_call_operand.vmem [shape: bf16[128,128], index: 5, kind: input, shape index: {}]   ;;  %s1070_s6 = inlined_call_operand.vmem [shape: f32[1,128], index: 6, kind: input, shape index: {}]   ;;  %s1071_s7 = inlined_call_operand.vmem [shape: f32[1,128], index: 7, kind: input, shape index: {}]   ;;  %s1072_s8 = inlined_call_operand.vmem [shape: f32[1,128], index: 8, kind: input, shape index: {}]   ;;  %s1073_s9 = inlined_call_operand.vmem [shape: bf16[128,2], index: 9, kind: input, shape index: {}]   ;;  %s1074_s10 = inlined_call_operand.vmem [shape: f32[1,2], index: 10, kind: input, shape index: {}]   ;;  %s1075_s11 = inlined_call_operand.vmem [shape: f32[32,2], index: 11, kind: output, shape index: {}]  }
   0x1 LB: > { %s765_s18 = sadd.s32 4294967295, %s898_s17   ;;  %p769_p0 = scmp.ge.s32.totalorder %s898_s17, 1  ;;  %s898_s17 = sphi %s961_s17, %s21_s17  }
   0x2   : > { %p338_p1 = scmp.lt.s32.totalorder %s898_s17, 3 }
   0x4   : > { %p339_p2 = pnand %p769_p0, %p338_p1 }
   0x5   : > { %s770_s21 = sshll.u32 (!%p339_p2), %s765_s18, 1 }
   0x6   : > { %342 = sbr.rel (%p339_p2) target bundleno = 976 (0x3d0), region = 64  ;;  %p379_p3 = scmp.lt.s32.totalorder (!%p339_p2), %s770_s21, 3 }
   0xb   : > { %v393_v0 = vld [vmem:[%s1065_s1] sm:$0xf]  ;;  %vm407_vm0 = vcmask 1043456   ;;  %s1077_s21 = smov (!%p379_p3, %s770_s21), 3  ;;  %vm403_vm1 = vcmask 64512   ;;  %v900_v8 = vmov 128.0  }
   0xc   : > { %v409_v1 = vsel %vm407_vm0, %v393_v0, 0  ;;  %s771_s22 = sshll.u32 %s1077_s21, 2  ;;  %v871_v3 = vld [vmem:[%s1066_s2] ss:$0 sm:$0xff]  ;;  %878 = vrcp.f32 %v900_v8  ;;  %v853_v23 = vld [vmem:[%s1069_s5 + $0x38] sm:$0xff]  ;;  %v852_v24 = vld [vmem:[%s1069_s5 + $0x30] sm:$0xff] }
   0xd   : > { %418 = vmatpush.bf16.msra.mxu0 %v409_v1  ;;  %s382_s25 = scalar_lea.vmem %s1064_s0, %s771_s22  ;;  %555 = vmatpush.bf16.msra.mxu1 %v853_v23  ;;  %v851_v25 = vld [vmem:[%s1069_s5 + $0x28] sm:$0xff]  ;;  %v850_v26 = vld [vmem:[%s1069_s5 + $0x20] sm:$0xff]  ;;  %v849_v27 = vld [vmem:[%s1069_s5 + $0x18] sm:$0xff]  ;;  %s773_s20 = sshll.u32 %s1077_s21, 3  ;;  %vm706_vm15 = vcmask 15360  }
   0xe   : > { %v845_v2 = vld [vmem:[%s382_s25] sm:$0xff]  ;;  %v848_v28 = vld [vmem:[%s1069_s5 + $0x10] sm:$0xff]  ;;  %v847_v29 = vld [vmem:[%s1069_s5 + $0x8] sm:$0xff]  ;;  %s388_s24 = scalar_lea.vmem %s1075_s11, %s773_s20 }
   0xf   : > { %v846_v32 = vld [vmem:[%s1069_s5] sm:$0xff] }
  0x10   : > { %778 = vmatmul.msk.bf16.vlgmr.msra.gmra.mxu0 %vm403_vm1, %v845_v2  ;;  %v872_v49 = vld [vmem:[%s1067_s3] ss:$0 sm:$0xff] }
  0x11   : > { %556 = vmatpush.bf16.msra.mxu1 %v852_v24  ;;  %v873_v53 = vld [vmem:[%s1068_s4] ss:$0 sm:$0xff] }
  0x12   : > { %v879_v9 = vpop.eup %878  ;;  %v874_v62 = vld [vmem:[%s1070_s6] ss:$0 sm:$0xff] }
  0x13   : > { %v432_v10 = vmul.f32 128.0, %v879_v9  ;;  %vm436_vm2 = vweird.f32 %v879_v9 }
  0x15   : > { %v433_v11 = vsub.f32 1.0, %v432_v10  ;;  %557 = vmatpush.bf16.msra.mxu1 %v851_v25 }
  0x17   : > { %v434_v12 = vmul.f32 %v879_v9, %v433_v11  ;;  %v861_v11 = vld [vmem:[%s1073_s9 + $0x38] sm:$0xff] }
  0x18   : > { %690 = vmatpush.bf16.msra.mxu2 %v861_v11 }
  0x19   : > { %v435_v13 = vadd.f32 %v879_v9, %v434_v12  ;;  %558 = vmatpush.bf16.msra.mxu1 %v850_v26  ;;  %v860_v12 = vld [vmem:[%s1073_s9 + $0x30] sm:$0xff] }
  0x1b   : > { %v981_v14 = vsel %vm436_vm2, %v879_v9, %v435_v13  ;;  %v859_v13 = vld [vmem:[%s1073_s9 + $0x28] sm:$0xff] }
  0x1c   : > { %691 = vmatpush.bf16.msra.mxu2 %v860_v12 }
  0x1d   : > { %559 = vmatpush.bf16.msra.mxu1 %v849_v27 }
  0x20   : > { %692 = vmatpush.bf16.msra.mxu2 %v859_v13 }
  0x21   : > { %560 = vmatpush.bf16.msra.mxu1 %v848_v28 }
  0x25   : > { %561 = vmatpush.bf16.msra.mxu1 %v847_v29 }
  0x29   : > { %562 = vmatpush.bf16.msra.mxu1 %v846_v32 }
  0x8d   : > { %v420_v4 = vpop.f32.mrf.mxu0 }
  0x8e   : > { %v421_v5 = vadd.f32 %v871_v3, %v420_v4 }
  0x90   : > { %427 = vadd.xlane.f32.xlu0 %v421_v5 }
  0x95   : > { %v422_v6 = vpop.f32.mrf.mxu0 }
  0x96   : > { %v423_v7 = vadd.f32 %v871_v3, %v422_v6 }
  0x98   : > { %429 = vadd.xlane.f32.xlu0 %v423_v7 }
 0x103   : > { %v428_v15 = vpop.xlane.xlu0 %427 }
 0x104   : > { %v438_v16 = vmul.f32 %v981_v14, %v428_v15  ;;  %v858_v15 = vld [vmem:[%s1073_s9 + $0x20] sm:$0xff] }
 0x105   : > { %693 = vmatpush.bf16.msra.mxu2 %v858_v15 }
 0x106   : > { %v440_v17 = vsub.f32 %v421_v5, %v438_v16  ;;  %v857_v16 = vld [vmem:[%s1073_s9 + $0x18] sm:$0xff] }
 0x108   : > { %v442_v18 = vmul.f32 %v440_v17, %v440_v17 }
 0x109   : > { %694 = vmatpush.bf16.msra.mxu2 %v857_v16 }
 0x10a   : > { %444 = vadd.xlane.f32.xlu1 %v442_v18  ;;  %v855_v18 = vld [vmem:[%s1073_s9 + $0x8] sm:$0xff] }
 0x10b   : > { %v430_v19 = vpop.xlane.xlu0 %429 }
 0x10c   : > { %v439_v20 = vmul.f32 %v981_v14, %v430_v19 }
 0x10e   : > { %v441_v21 = vsub.f32 %v423_v7, %v439_v20  ;;  %v854_v20 = vld [vmem:[%s1073_s9] sm:$0xff] }
 0x110   : > { %v443_v22 = vmul.f32 %v441_v21, %v441_v21 }
 0x112   : > { %446 = vadd.xlane.f32.xlu1 %v443_v22 }
 0x17d   : > { %v445_v30 = vpop.xlane.xlu1 %444 }
 0x17e   : > { %v448_v31 = vmul.f32 %v445_v30, %v981_v14 }
 0x180   : > { %v450_v33 = vadd.f32 1e-05, %v448_v31 }
 0x182   : > { %880 = vrsqrt.f32 %v450_v33  ;;  %vm458_vm4 = vweird.f32 %v450_v33 }
 0x185   : > { %v447_v34 = vpop.xlane.xlu1 %446 }
 0x186   : > { %v449_v35 = vmul.f32 %v447_v34, %v981_v14 }
 0x188   : > { %v881_v36 = vpop.eup %880  ;;  %v451_v37 = vadd.f32 1e-05, %v449_v35 }
 0x189   : > { %v453_v38 = vmul.f32 %v881_v36, %v450_v33  ;;  %vm459_vm3 = vweird.f32 %v881_v36 }
 0x18a   : > { %882 = vrsqrt.f32 %v451_v37  ;;  %vm460_vm5 = vmor %vm458_vm4, %vm459_vm3  ;;  %vm468_vm7 = vweird.f32 %v451_v37 }
 0x18b   : > { %v454_v39 = vmul.f32 %v881_v36, %v453_v38 }
 0x18d   : > { %v455_v40 = vmul.f32 0.5, %v454_v39 }
 0x18f   : > { %v456_v41 = vsub.f32 1.5, %v455_v40 }
 0x190   : > { %v883_v42 = vpop.eup %882 }
 0x191   : > { %v457_v43 = vmul.f32 %v881_v36, %v456_v41  ;;  %v463_v44 = vmul.f32 %v883_v42, %v451_v37  ;;  %vm469_vm6 = vweird.f32 %v883_v42 }
 0x192   : > { %vm470_vm8 = vmor %vm468_vm7, %vm469_vm6 }
 0x193   : > { %v461_v45 = vsel %vm460_vm5, %v881_v36, %v457_v43  ;;  %v464_v46 = vmul.f32 %v883_v42, %v463_v44  ;;  %v876_v43 = vld [vmem:[%s1072_s8] ss:$0 sm:$0xff] }
 0x194   : > { %v472_v48 = vmul.f32 %v461_v45, %v440_v17  ;;  %v856_v17 = vld [vmem:[%s1073_s9 + $0x10] sm:$0xff] }
 0x195   : > { %v465_v47 = vmul.f32 0.5, %v464_v46  ;;  %695 = vmatpush.bf16.msra.mxu2 %v856_v17 }
 0x196   : > { %v477_v52 = vmul.f32 %v872_v49, %v472_v48  ;;  %v877_v48 = vld [vmem:[%s1074_s10] ss:$0 sm:$0xff] }
 0x197   : > { %v466_v50 = vsub.f32 1.5, %v465_v47 }
 0x198   : > { %v482_v57 = vadd.f32 %v873_v53, %v477_v52 }
 0x199   : > { %v467_v51 = vmul.f32 %v883_v42, %v466_v50  ;;  %696 = vmatpush.bf16.msra.mxu2 %v855_v18 }
 0x19a   : > { %v484_v59 = vmax.f32 %v482_v57, 0.0 }
 0x19b   : > { %v471_v54 = vsel %vm470_vm8, %v883_v42, %v467_v51 }
 0x19c   : > { %v473_v55 = vmul.f32 %v471_v54, %v441_v21 }
 0x19d   : > { %697 = vmatpush.bf16.msra.mxu2 %v854_v20 }
 0x19e   : > { %v478_v56 = vmul.f32 %v872_v49, %v473_v55 }
 0x1a0   : > { %v483_v58 = vadd.f32 %v873_v53, %v478_v56 }
 0x1a2   : > { %v485_v60 = vmax.f32 %v483_v58, 0.0 }
 0x1a4   : > { %v486_v61 = vpack.c.bf16 %v485_v60, %v484_v59 }
 0x1a6   : > { %563 = vmatmul.bf16.vlgmr.msra.gmra.mxu1 %v486_v61 }
 0x223   : > { %v564_v63 = vpop.f32.mrf.mxu1 }
 0x224   : > { %v565_v0 = vadd.f32 %v874_v62, %v564_v63 }
 0x226   : > { %571 = vadd.xlane.f32.xlu2 %v565_v0 }
 0x22b   : > { %v566_v1 = vpop.f32.mrf.mxu1 }
 0x22c   : > { %v567_v2 = vadd.f32 %v874_v62, %v566_v1 }
 0x22e   : > { %573 = vadd.xlane.f32.xlu2 %v567_v2 }
 0x299   : > { %v572_v3 = vpop.xlane.xlu2 %571 }
 0x29a   : > { %v575_v4 = vmul.f32 %v572_v3, %v981_v14 }
 0x29c   : > { %v577_v5 = vsub.f32 %v565_v0, %v575_v4 }
 0x29e   : > { %v579_v6 = vmul.f32 %v577_v5, %v577_v5 }
 0x2a0   : > { %581 = vadd.xlane.f32.xlu0 %v579_v6 }
 0x2a1   : > { %v574_v7 = vpop.xlane.xlu2 %573 }
 0x2a2   : > { %v576_v8 = vmul.f32 %v574_v7, %v981_v14 }
 0x2a4   : > { %v578_v9 = vsub.f32 %v567_v2, %v576_v8 }
 0x2a6   : > { %v580_v10 = vmul.f32 %v578_v9, %v578_v9 }
 0x2a8   : > { %583 = vadd.xlane.f32.xlu1 %v580_v10 }
 0x313   : > { %v582_v19 = vpop.xlane.xlu0 %581 }
 0x314   : > { %v585_v21 = vmul.f32 %v582_v19, %v981_v14 }
 0x316   : > { %v587_v22 = vadd.f32 1e-05, %v585_v21 }
 0x318   : > { %884 = vrsqrt.f32 %v587_v22  ;;  %vm595_vm10 = vweird.f32 %v587_v22 }
 0x31b   : > { %v584_v23 = vpop.xlane.xlu1 %583 }
 0x31c   : > { %v586_v24 = vmul.f32 %v584_v23, %v981_v14  ;;  %v875_v14 = vld [vmem:[%s1071_s7] ss:$0 sm:$0xff] }
 0x31e   : > { %v885_v25 = vpop.eup %884  ;;  %v588_v26 = vadd.f32 1e-05, %v586_v24 }
 0x31f   : > { %v590_v27 = vmul.f32 %v885_v25, %v587_v22  ;;  %vm596_vm9 = vweird.f32 %v885_v25 }
 0x320   : > { %886 = vrsqrt.f32 %v588_v26  ;;  %vm597_vm11 = vmor %vm595_vm10, %vm596_vm9  ;;  %vm605_vm13 = vweird.f32 %v588_v26 }
 0x321   : > { %v591_v28 = vmul.f32 %v885_v25, %v590_v27 }
 0x323   : > { %v592_v29 = vmul.f32 0.5, %v591_v28 }
 0x325   : > { %v593_v30 = vsub.f32 1.5, %v592_v29 }
 0x326   : > { %v887_v31 = vpop.eup %886 }
 0x327   : > { %v594_v32 = vmul.f32 %v885_v25, %v593_v30  ;;  %v600_v33 = vmul.f32 %v887_v31, %v588_v26  ;;  %vm606_vm12 = vweird.f32 %v887_v31 }
 0x328   : > { %vm607_vm14 = vmor %vm605_vm13, %vm606_vm12 }
 0x329   : > { %v601_v34 = vmul.f32 %v887_v31, %v600_v33  ;;  %v598_v36 = vsel %vm597_vm11, %v885_v25, %v594_v32 }
 0x32a   : > { %v609_v38 = vmul.f32 %v598_v36, %v577_v5 }
 0x32b   : > { %v602_v35 = vmul.f32 0.5, %v601_v34 }
 0x32c   : > { %v614_v42 = vmul.f32 %v875_v14, %v609_v38 }
 0x32d   : > { %v603_v37 = vsub.f32 1.5, %v602_v35 }
 0x32e   : > { %v619_v45 = vadd.f32 %v876_v43, %v614_v42 }
 0x32f   : > { %v604_v39 = vmul.f32 %v887_v31, %v603_v37 }
 0x331   : > { %v608_v40 = vsel %vm607_vm14, %v887_v31, %v604_v39 }
 0x332   : > { %v610_v41 = vmul.f32 %v608_v40, %v578_v9 }
 0x334   : > { %v615_v44 = vmul.f32 %v875_v14, %v610_v41 }
 0x336   : > { %v620_v46 = vadd.f32 %v876_v43, %v615_v44 }
 0x338   : > { %v621_v47 = vpack.c.bf16 %v620_v46, %v619_v45 }
 0x33a   : > { %698 = vmatmul.bf16.vlgmr.msra.gmra.mxu2 %v621_v47 }
 0x3bd   : > { %v699_v49 = vpop.f32.mrf.mxu2 }
 0x3be   : > { %v700_v50 = vadd.f32 %v877_v48, %v699_v49 }
 0x3c0   : > { %888 = vtanh.f32 %v700_v50 }
 0x3c5   : > { %v701_v51 = vpop.f32.mrf.mxu2 }
 0x3c6   : > { %v889_v52 = vpop.eup %888  ;;  %v702_v53 = vadd.f32 %v877_v48, %v701_v51 }
 0x3c7   : > { %707 = vst.msk [vmem:[%s388_s24] sm:$0xff] %vm706_vm15, %v889_v52 }
 0x3c8   : > { %890 = vtanh.f32 %v702_v53 }
 0x3ce   : > { %v891_v54 = vpop.eup %890 }
 0x3cf   : > { %708 = vst.msk [vmem:[%s388_s24 + $0x8] sm:$0xff] %vm706_vm15, %v891_v54 }
 0x3d0 PF: > { %s21_s17 = sadd.s32 1, %s898_s17  }
 0x3d1   : > { %p18_p4 = scmp.ge.s32.totalorder %s21_s17, 4  }
 0x3d3   :  { %20 = sbr.rel (!%p18_p4) target bundleno = 1 (0x1), region = 94 }

</bundles_post_ra>
